<compile_context>
chip_gen: v7x
topology: tpu7x:2x2x1
jax: 0.10.0
libtpu: 0.0.40
codegen_flags: <defaults>
</compile_context>

<pallas_src>
import functools
import math

import jax
import jax.numpy as jnp
from jax import lax
from jax.experimental import pallas as pl
from jax.experimental.pallas import tpu as pltpu


# ----------------------------------------------------------------------------
# Hardware-aware configuration helpers
# ----------------------------------------------------------------------------
def _tpu_config():
    """Returns (vmem_capacity_bytes, wide_mxu) with safe fallbacks."""
    kind = ""
    try:
        kind = jax.devices()[0].device_kind.lower()
    except Exception:
        pass
    try:
        vmem = int(pltpu.get_tpu_info().vmem_capacity_bytes)
    except Exception:
        vmem = (64 << 20) if "v7" in kind else (128 << 20)
    wide_mxu = any(t in kind for t in ("v6", "v7"))   # 2x256^2 MXU generations
    return vmem, wide_mxu


def _spec(block_shape, index_map, *, buffers=None):
    """BlockSpec with optional pipeline_mode=pl.Buffered(n); clean fallback."""
    if buffers is not None and hasattr(pl, "Buffered"):
        try:
            return pl.BlockSpec(block_shape, index_map,
                                pipeline_mode=pl.Buffered(buffers))
        except Exception:
            pass
    return pl.BlockSpec(block_shape, index_map)


def _choose_tile(s, cap, multiple):
    """Largest divisor of s that is <= cap and a multiple of `multiple`.

    A block equal to the full dimension is always layout-legal, so s <= cap
    returns s.  Otherwise fail loudly instead of silently blowing the VMEM
    budget with a full-length tile.
    """
    if s <= cap:
        return s
    start = cap - (cap % multiple)
    for t in range(start, multiple - 1, -multiple):
        if s % t == 0:
            return t
    raise ValueError(
        f"sequence length {s} has no tile <= {cap} that is a multiple of "
        f"{multiple}; pad the sequence length")


def _pad_last(a, target):
    pad = target - a.shape[-1]
    if pad == 0:
        return a
    return jnp.pad(a, [(0, 0)] * (a.ndim - 1) + [(0, pad)])


# ----------------------------------------------------------------------------
# Pass 1: Q/K/V projections (computed exactly once per row)
# ----------------------------------------------------------------------------
def _qkv_proj_kernel(x_ref, wq_ref, bq_ref, wk_ref, bk_ref, wv_ref, bv_ref,
                     q_ref, k_ref, v_ref, *, scale):
    """Grid = (batch, row_tiles).  Projects one (tproj, ep) row tile.

    Weights stay in the PyTorch (out, in) layout; the "NT" dot_general
    contracts the last dims so no transpose is ever materialized.  Q carries
    the bias and the 1/sqrt(E) scale (an (tproj, ep) operand, cheaper than
    scaling the (tq, tkv) score matrices later).
    """
    nt = (((1,), (1,)), ((), ()))
    x = x_ref[0]
    q = lax.dot_general(x, wq_ref[...], nt, preferred_element_type=jnp.float32)
    q_ref[0] = ((q + bq_ref[...]) * scale).astype(q_ref.dtype)
    k = lax.dot_general(x, wk_ref[...], nt, preferred_element_type=jnp.float32)
    k_ref[0] = (k + bk_ref[...]).astype(k_ref.dtype)
    v = lax.dot_general(x, wv_ref[...], nt, preferred_element_type=jnp.float32)
    v_ref[0] = (v + bv_ref[...]).astype(v_ref.dtype)


# ----------------------------------------------------------------------------
# Pass 2: flash attention over the projected Q/K/V
# ----------------------------------------------------------------------------
def _flash_attn_kernel(q_ref, k_ref, v_ref, o_ref, m_scr, l_scr, acc_scr, *,
                       out_e, approx_recip):
    """Grid = (batch, q_tiles, kv_tiles); kv is the innermost reduction axis.

    q_ref : (1, tq,  ep)   pre-scaled Q tile (block index constant over ki)
    k_ref : (1, tkv, ep)   projected K tile
    v_ref : (1, tkv, ep)   projected V tile
    o_ref : (1, tq, out_e) output block (resident across kv steps)
    """
    ki = pl.program_id(2)
    nt = (((1,), (1,)), ((), ()))   # contract last dims -> no XLU transpose

    @pl.when(ki == 0)
    def _init():
        m_scr[...] = jnp.full_like(m_scr, -jnp.inf)
        l_scr[...] = jnp.zeros_like(l_scr)
        acc_scr[...] = jnp.zeros_like(acc_scr)

    # Attention scores (tq, tkv); Q already carries bias + 1/sqrt(E).
    s = lax.dot_general(q_ref[0], k_ref[0], nt,
                        preferred_element_type=jnp.float32)

    # Online-softmax update (all f32).
    m_prev = m_scr[...]
    m_new = jnp.maximum(m_prev, jnp.max(s, axis=-1, keepdims=True))
    alpha = jnp.exp(m_prev - m_new)
    p = jnp.exp(s - m_new)
    l_scr[...] = alpha * l_scr[...] + jnp.sum(p, axis=-1, keepdims=True)
    acc_scr[...] = alpha * acc_scr[...] + jnp.dot(
        p.astype(v_ref.dtype), v_ref[0], preferred_element_type=jnp.float32)
    m_scr[...] = m_new

    @pl.when(ki == pl.num_programs(2) - 1)
    def _finalize():
        if approx_recip:
            inv_l = pl.reciprocal(l_scr[...], approx=True)   # EUP slot (bf16 path)
        else:
            inv_l = 1.0 / l_scr[...]                          # exact (f32 path)
        acc = acc_scr[...]
        if out_e != acc.shape[-1]:
            acc = acc[:, :out_e]                              # lane-aligned slice
        o_ref[0] = (acc * inv_l).astype(o_ref.dtype)


# ----------------------------------------------------------------------------
# Wrapper
# ----------------------------------------------------------------------------
def self_attention(x, wq, bq, wk, bk, wv, bv, *, mxu_dtype=jnp.bfloat16):
    """x: (B, S, E) f32.  w*: (E, E) PyTorch (out, in) layout.  b*: (E,)."""
    B, S, E = x.shape
    scale = 1.0 / math.sqrt(E)
    msz = jnp.dtype(mxu_dtype).itemsize
    exact = jnp.dtype(mxu_dtype) == jnp.dtype(jnp.float32)

    vmem_cap, wide_mxu = _tpu_config()
    vmem_budget = int(vmem_cap * 0.85)   # leave compiler-scratch headroom

    # Lane-dense embed dim; 256-aligned on 256-wide-MXU chips when E > 128.
    align = 256 if (wide_mxu and E > 128) else 128
    ep = -(-E // align) * align

    # Per-generation tile caps: v7x has only 64 MiB VMEM per TensorCore.
    if vmem_cap <= (64 << 20):
        tq_cap, tkv_cap = 128, 256
    else:
        tq_cap, tkv_cap = 256, 256
    tq = _choose_tile(S, tq_cap, 16)        # sublane-packed q tile
    tkv = _choose_tile(S, tkv_cap, 128)     # lane-dense kv tile
    tproj = _choose_tile(S, 512, 8)         # projection row tile

    # One-time layout glue: zero-pad embed dim + cast.  Padded Q/K/V columns
    # stay exactly zero through the projections, so results are unchanged.
    x_p = _pad_last(x, ep).astype(mxu_dtype)

    def pad_w(w):
        return jnp.pad(w, ((0, ep - E), (0, ep - E))).astype(mxu_dtype)

    def pad_b(bias):
        return _pad_last(bias, ep)[None, :].astype(jnp.float32)

    wq_p, wk_p, wv_p = pad_w(wq), pad_w(wk), pad_w(wv)
    bq_p, bk_p, bv_p = pad_b(bq), pad_b(bk), pad_b(bv)

    # ------------------------- projection pass ------------------------------
    w_spec = _spec((ep, ep), lambda b, i: (0, 0), buffers=1)   # resident, 1-buf
    b_spec = _spec((1, ep), lambda b, i: (0, 0), buffers=1)
    row_spec = pl.BlockSpec((1, tproj, ep), lambda b, i: (b, i, 0))

    est_proj = (2 * tproj * ep * msz            # x tile (double-buffered)
                + 3 * ep * ep * msz             # single-buffered weights
                + 3 * ep * 4                    # biases
                + 2 * 3 * tproj * ep * msz      # q/k/v output blocks
                + 3 * tproj * ep * 4)           # f32 temporaries
    vmem_proj = int(min(max(2 * est_proj + (16 << 20), 32 << 20), vmem_budget))

    qkv_shape = jax.ShapeDtypeStruct((B, S, ep), mxu_dtype)
    q, k, v = pl.pallas_call(
        functools.partial(_qkv_proj_kernel, scale=scale),
        out_shape=(qkv_shape, qkv_shape, qkv_shape),
        grid_spec=pltpu.PrefetchScalarGridSpec(
            num_scalar_prefetch=0,
            grid=(B, S // tproj),
            in_specs=[row_spec, w_spec, b_spec, w_spec, b_spec, w_spec, b_spec],
            out_specs=(row_spec, row_spec, row_spec)),
        compiler_params=pltpu.CompilerParams(
            dimension_semantics=("parallel", "parallel"),
            vmem_limit_bytes=vmem_proj),
    )(x_p, wq_p, bq_p, wk_p, bk_p, wv_p, bv_p)

    # ------------------------- flash attention pass -------------------------
    # Skip the embed padding on the output whenever E is already lane-dense:
    # unmasked stores and no wrapper slice copy.
    out_e = E if E % 128 == 0 else ep

    kv_bufs = 3
    est_flash = (2 * tq * ep * msz                 # q block (resident per (b,qi))
                 + 2 * kv_bufs * tkv * ep * msz    # k + v blocks (3-deep)
                 + 2 * tq * out_e * 4              # output block
                 + tq * ep * 4 + 2 * tq * 4        # acc / m / l scratch
                 + 4 * tq * tkv * 4)               # s / p temporaries
    vmem_flash = int(min(max(2 * est_flash + (16 << 20), 32 << 20), vmem_budget))

    q_spec = pl.BlockSpec((1, tq, ep), lambda b, qi, ki: (b, qi, 0))
    kv_spec = _spec((1, tkv, ep), lambda b, qi, ki: (b, ki, 0), buffers=kv_bufs)

    out = pl.pallas_call(
        functools.partial(_flash_attn_kernel, out_e=out_e,
                          approx_recip=not exact),
        out_shape=jax.ShapeDtypeStruct((B, S, out_e), x.dtype),
        grid_spec=pltpu.PrefetchScalarGridSpec(
            num_scalar_prefetch=0,
            grid=(B, S // tq, S // tkv),
            in_specs=[q_spec, kv_spec, kv_spec],
            out_specs=pl.BlockSpec((1, tq, out_e), lambda b, qi, ki: (b, qi, 0)),
            scratch_shapes=[
                pltpu.VMEM((tq, 1), jnp.float32),    # running max  m
                pltpu.VMEM((tq, 1), jnp.float32),    # running sum  l
                pltpu.VMEM((tq, ep), jnp.float32),   # output accumulator
            ]),
        compiler_params=pltpu.CompilerParams(
            # batch + q-tile axes shard across v7x's two TensorCores; the kv
            # reduction axis stays "arbitrary" (accumulator in scratch).
            dimension_semantics=("parallel", "parallel", "arbitrary"),
            vmem_limit_bytes=vmem_flash),
    )(q, k, v)

    return out if out_e == E else out[..., :E]


def self_attention_ref(x, wq, bq, wk, bk, wv, bv):
    """Pure-JAX reference matching the PyTorch forward exactly."""
    E = x.shape[-1]
    q = x @ wq.T + bq
    k = x @ wk.T + bk
    v = x @ wv.T + bv
    scores = jnp.matmul(q, jnp.swapaxes(k, -2, -1)) / math.sqrt(E)
    attn = jax.nn.softmax(scores, axis=-1)
    return jnp.matmul(attn, v)


if __name__ == "__main__":
    B, S, E = 2, 8, 32   # batch, seq, embed_size

    key = jax.random.PRNGKey(0)
    kx, kq, kbq, kk, kbk, kv_, kbv = jax.random.split(key, 7)

    # nn.Linear-style U(-1/sqrt(in), 1/sqrt(in)) init.
    bound = 1.0 / math.sqrt(E)
    x = jax.random.normal(kx, (B, S, E), dtype=jnp.float32)
    wq = jax.random.uniform(kq, (E, E), jnp.float32, -bound, bound)
    bq = jax.random.uniform(kbq, (E,), jnp.float32, -bound, bound)
    wk = jax.random.uniform(kk, (E, E), jnp.float32, -bound, bound)
    bk = jax.random.uniform(kbk, (E,), jnp.float32, -bound, bound)
    wv = jax.random.uniform(kv_, (E, E), jnp.float32, -bound, bound)
    bv = jax.random.uniform(kbv, (E,), jnp.float32, -bound, bound)

    ref = self_attention_ref(x, wq, bq, wk, bk, wv, bv)

    # Exact path: f32 MXU operands, f32 accumulation, exact reciprocal.
    out_f32 = jax.block_until_ready(
        self_attention(x, wq, bq, wk, bk, wv, bv, mxu_dtype=jnp.float32))
    assert out_f32.shape == (B, S, E)
    assert jnp.allclose(out_f32, ref, atol=2e-3, rtol=2e-3), \
        float(jnp.max(jnp.abs(out_f32 - ref)))

    # Fast path: bf16 MXU operands + f32 accumulation (MXU peak on all gens).
    out_bf16 = jax.block_until_ready(
        self_attention(x, wq, bq, wk, bk, wv, bv, mxu_dtype=jnp.bfloat16))
    assert out_bf16.shape == (B, S, E)
    assert jnp.allclose(out_bf16, ref, atol=3e-2, rtol=3e-2), \
        float(jnp.max(jnp.abs(out_bf16 - ref)))

    print("KERNEL_OK")
</pallas_src>

<mosaic_0001>
module attributes {stable_mosaic.version = 11 : i64} {
  func.func @_qkv_proj_kernel(%arg0: i32, %arg1: i32, %arg2: memref<1x8x128xf32, #tpu.memory_space<vmem>>, %arg3: memref<128x128xf32, #tpu.memory_space<vmem>>, %arg4: memref<1x128xf32, #tpu.memory_space<vmem>>, %arg5: memref<128x128xf32, #tpu.memory_space<vmem>>, %arg6: memref<1x128xf32, #tpu.memory_space<vmem>>, %arg7: memref<128x128xf32, #tpu.memory_space<vmem>>, %arg8: memref<1x128xf32, #tpu.memory_space<vmem>>, %arg9: memref<1x8x128xf32, #tpu.memory_space<vmem>>, %arg10: memref<1x8x128xf32, #tpu.memory_space<vmem>>, %arg11: memref<1x8x128xf32, #tpu.memory_space<vmem>>) attributes {dimension_semantics = [#tpu.dimension_semantics<parallel>, #tpu.dimension_semantics<parallel>], iteration_bounds = array<i64: 2, 1>, scalar_prefetch = 0 : i64, scratch_operands = 0 : i64, tpu.core_type = #tpu.core_type<tc>, window_params = [{transform_indices = @transform_0, window_bounds = array<i64: 1, 8, 128>}, {pipeline_mode = #tpu.pipeline_mode<synchronous>, transform_indices = @transform_1, window_bounds = array<i64: 128, 128>}, {pipeline_mode = #tpu.pipeline_mode<synchronous>, transform_indices = @transform_2, window_bounds = array<i64: 1, 128>}, {pipeline_mode = #tpu.pipeline_mode<synchronous>, transform_indices = @transform_3, window_bounds = array<i64: 128, 128>}, {pipeline_mode = #tpu.pipeline_mode<synchronous>, transform_indices = @transform_4, window_bounds = array<i64: 1, 128>}, {pipeline_mode = #tpu.pipeline_mode<synchronous>, transform_indices = @transform_5, window_bounds = array<i64: 128, 128>}, {pipeline_mode = #tpu.pipeline_mode<synchronous>, transform_indices = @transform_6, window_bounds = array<i64: 1, 128>}, {transform_indices = @transform_7, window_bounds = array<i64: 1, 8, 128>}, {transform_indices = @transform_8, window_bounds = array<i64: 1, 8, 128>}, {transform_indices = @transform_9, window_bounds = array<i64: 1, 8, 128>}]} {
    %c0 = arith.constant 0 : index
    %c0_0 = arith.constant 0 : index
    %c0_1 = arith.constant 0 : index
    %0 = vector.load %arg2[%c0, %c0_0, %c0_1] : memref<1x8x128xf32, #tpu.memory_space<vmem>>, vector<1x8x128xf32>
    %1 = vector.shape_cast %0 : vector<1x8x128xf32> to vector<8x128xf32>
    %c0_2 = arith.constant 0 : index
    %c0_3 = arith.constant 0 : index
    %2 = vector.load %arg3[%c0_2, %c0_3] : memref<128x128xf32, #tpu.memory_space<vmem>>, vector<128x128xf32>
    %cst = arith.constant dense<0.000000e+00> : vector<8x128xf32>
    %3 = tpu.matmul %1, %2, %cst {dimension_numbers = #tpu.dot_dimension_numbers<[1], [1], [0], [0], [0, 0, 1, 0], [], []>} : vector<8x128xf32>, vector<128x128xf32>, vector<8x128xf32> -> vector<8x128xf32>
    %c0_4 = arith.constant 0 : index
    %c0_5 = arith.constant 0 : index
    %4 = vector.load %arg4[%c0_4, %c0_5] : memref<1x128xf32, #tpu.memory_space<vmem>>, vector<1x128xf32>
    %5 = vector.broadcast %4 : vector<1x128xf32> to vector<8x128xf32>
    %6 = arith.addf %3, %5 : vector<8x128xf32>
    %cst_6 = arith.constant 0.176776692 : f32
    %7 = vector.broadcast %cst_6 : f32 to vector<8x128xf32>
    %8 = arith.mulf %6, %7 : vector<8x128xf32>
    %c0_7 = arith.constant 0 : index
    %c0_8 = arith.constant 0 : index
    %c0_9 = arith.constant 0 : index
    %9 = vector.load %arg9[%c0_7, %c0_8, %c0_9] : memref<1x8x128xf32, #tpu.memory_space<vmem>>, vector<1x8x128xf32>
    %10 = vector.shape_cast %9 : vector<1x8x128xf32> to vector<8x128xf32>
    %11 = vector.shape_cast %8 : vector<8x128xf32> to vector<1x8x128xf32>
    tpu.vector_store %arg9[%c0_7, %c0_8, %c0_9], %11 {strides = array<i32>} : memref<1x8x128xf32, #tpu.memory_space<vmem>>, vector<1x8x128xf32>,
    %c0_10 = arith.constant 0 : index
    %c0_11 = arith.constant 0 : index
    %12 = vector.load %arg5[%c0_10, %c0_11] : memref<128x128xf32, #tpu.memory_space<vmem>>, vector<128x128xf32>
    %cst_12 = arith.constant dense<0.000000e+00> : vector<8x128xf32>
    %13 = tpu.matmul %1, %12, %cst_12 {dimension_numbers = #tpu.dot_dimension_numbers<[1], [1], [0], [0], [0, 0, 1, 0], [], []>} : vector<8x128xf32>, vector<128x128xf32>, vector<8x128xf32> -> vector<8x128xf32>
    %c0_13 = arith.constant 0 : index
    %c0_14 = arith.constant 0 : index
    %14 = vector.load %arg6[%c0_13, %c0_14] : memref<1x128xf32, #tpu.memory_space<vmem>>, vector<1x128xf32>
    %15 = vector.broadcast %14 : vector<1x128xf32> to vector<8x128xf32>
    %16 = arith.addf %13, %15 : vector<8x128xf32>
    %c0_15 = arith.constant 0 : index
    %c0_16 = arith.constant 0 : index
    %c0_17 = arith.constant 0 : index
    %17 = vector.load %arg10[%c0_15, %c0_16, %c0_17] : memref<1x8x128xf32, #tpu.memory_space<vmem>>, vector<1x8x128xf32>
    %18 = vector.shape_cast %17 : vector<1x8x128xf32> to vector<8x128xf32>
    %19 = vector.shape_cast %16 : vector<8x128xf32> to vector<1x8x128xf32>
    tpu.vector_store %arg10[%c0_15, %c0_16, %c0_17], %19 {strides = array<i32>} : memref<1x8x128xf32, #tpu.memory_space<vmem>>, vector<1x8x128xf32>,
    %c0_18 = arith.constant 0 : index
    %c0_19 = arith.constant 0 : index
    %20 = vector.load %arg7[%c0_18, %c0_19] : memref<128x128xf32, #tpu.memory_space<vmem>>, vector<128x128xf32>
    %cst_20 = arith.constant dense<0.000000e+00> : vector<8x128xf32>
    %21 = tpu.matmul %1, %20, %cst_20 {dimension_numbers = #tpu.dot_dimension_numbers<[1], [1], [0], [0], [0, 0, 1, 0], [], []>} : vector<8x128xf32>, vector<128x128xf32>, vector<8x128xf32> -> vector<8x128xf32>
    %c0_21 = arith.constant 0 : index
    %c0_22 = arith.constant 0 : index
    %22 = vector.load %arg8[%c0_21, %c0_22] : memref<1x128xf32, #tpu.memory_space<vmem>>, vector<1x128xf32>
    %23 = vector.broadcast %22 : vector<1x128xf32> to vector<8x128xf32>
    %24 = arith.addf %21, %23 : vector<8x128xf32>
    %c0_23 = arith.constant 0 : index
    %c0_24 = arith.constant 0 : index
    %c0_25 = arith.constant 0 : index
    %25 = vector.load %arg11[%c0_23, %c0_24, %c0_25] : memref<1x8x128xf32, #tpu.memory_space<vmem>>, vector<1x8x128xf32>
    %26 = vector.shape_cast %25 : vector<1x8x128xf32> to vector<8x128xf32>
    %27 = vector.shape_cast %24 : vector<8x128xf32> to vector<1x8x128xf32>
    tpu.vector_store %arg11[%c0_23, %c0_24, %c0_25], %27 {strides = array<i32>} : memref<1x8x128xf32, #tpu.memory_space<vmem>>, vector<1x8x128xf32>,
    return
  }
  func.func @transform_0(%arg0: i32, %arg1: i32) -> (i32, i32, i32) {
    %c0_i32 = arith.constant 0 : i32
    %c0_i32_0 = arith.constant 0 : i32
    return %arg0, %arg1, %c0_i32 : i32, i32, i32
  }
  func.func @transform_1(%arg0: i32, %arg1: i32) -> (i32, i32) {
    %c0_i32 = arith.constant 0 : i32
    %c0_i32_0 = arith.constant 0 : i32
    %c0_i32_1 = arith.constant 0 : i32
    return %c0_i32, %c0_i32_0 : i32, i32
  }
  func.func @transform_2(%arg0: i32, %arg1: i32) -> (i32, i32) {
    %c0_i32 = arith.constant 0 : i32
    %c0_i32_0 = arith.constant 0 : i32
    %c0_i32_1 = arith.constant 0 : i32
    return %c0_i32, %c0_i32_0 : i32, i32
  }
  func.func @transform_3(%arg0: i32, %arg1: i32) -> (i32, i32) {
    %c0_i32 = arith.constant 0 : i32
    %c0_i32_0 = arith.constant 0 : i32
    %c0_i32_1 = arith.constant 0 : i32
    return %c0_i32, %c0_i32_0 : i32, i32
  }
  func.func @transform_4(%arg0: i32, %arg1: i32) -> (i32, i32) {
    %c0_i32 = arith.constant 0 : i32
    %c0_i32_0 = arith.constant 0 : i32
    %c0_i32_1 = arith.constant 0 : i32
    return %c0_i32, %c0_i32_0 : i32, i32
  }
  func.func @transform_5(%arg0: i32, %arg1: i32) -> (i32, i32) {
    %c0_i32 = arith.constant 0 : i32
    %c0_i32_0 = arith.constant 0 : i32
    %c0_i32_1 = arith.constant 0 : i32
    return %c0_i32, %c0_i32_0 : i32, i32
  }
  func.func @transform_6(%arg0: i32, %arg1: i32) -> (i32, i32) {
    %c0_i32 = arith.constant 0 : i32
    %c0_i32_0 = arith.constant 0 : i32
    %c0_i32_1 = arith.constant 0 : i32
    return %c0_i32, %c0_i32_0 : i32, i32
  }
  func.func @transform_7(%arg0: i32, %arg1: i32) -> (i32, i32, i32) {
    %c0_i32 = arith.constant 0 : i32
    %c0_i32_0 = arith.constant 0 : i32
    return %arg0, %arg1, %c0_i32 : i32, i32, i32
  }
  func.func @transform_8(%arg0: i32, %arg1: i32) -> (i32, i32, i32) {
    %c0_i32 = arith.constant 0 : i32
    %c0_i32_0 = arith.constant 0 : i32
    return %arg0, %arg1, %c0_i32 : i32, i32, i32
  }
  func.func @transform_9(%arg0: i32, %arg1: i32) -> (i32, i32, i32) {
    %c0_i32 = arith.constant 0 : i32
    %c0_i32_0 = arith.constant 0 : i32
    return %arg0, %arg1, %c0_i32 : i32, i32, i32
  }
}

</mosaic_0001>

<bundles_post_ra>
// kernel: tpu_custom_call.1
= control target key start
LH: loop header
LB: loop body
LE: loop exit
PB: predicated region body
PF: predicated region fallthrough
CT: control target
= control target key end

     0   :  { %s2029_s0 = inlined_call_operand.hbm [shape: f32[2,8,128], index: 0, kind: input, shape index: {}]   ;;  %s2030_s1 = inlined_call_operand.hbm [shape: f32[128,128], index: 1, kind: input, shape index: {}]   ;;  %s2031_s2 = inlined_call_operand.vmem [shape: f32[1,128], index: 2, kind: input, shape index: {}]   ;;  %s2032_s3 = inlined_call_operand.hbm [shape: f32[128,128], index: 3, kind: input, shape index: {}]   ;;  %s2033_s4 = inlined_call_operand.vmem [shape: f32[1,128], index: 4, kind: input, shape index: {}]   ;;  %s2034_s5 = inlined_call_operand.hbm [shape: f32[128,128], index: 5, kind: input, shape index: {}]   ;;  %s2035_s6 = inlined_call_operand.vmem [shape: f32[1,128], index: 6, kind: input, shape index: {}]   ;;  %s2036_s7 = inlined_call_operand.hbm [shape: f32[2,8,128], index: 7, kind: output, shape index: {0}]   ;;  %s2037_s8 = inlined_call_operand.hbm [shape: f32[2,8,128], index: 8, kind: output, shape index: {1}]   ;;  %s2038_s9 = inlined_call_operand.hbm [shape: f32[2,8,128], index: 9, kind: output, shape index: {2}]  }
   0x1   :  { %2048 = sst [smem:[#allocation21_spill]] %s2035_s6 }
   0x2   :  { %2049 = sst [smem:[#allocation22_spill]] %s2037_s8 }
   0x3   :  { %2050 = sst [smem:[#allocation23_spill]] %s2038_s9 }
   0x4   :  { %15 = vsyncpa [#allocation3], 0 }
   0x5   :  { %17 = vsyncpa [#allocation3 + $0x1], 0 }
   0x6   :  { %18 = vsyncpa [#allocation6], 0 }
   0x7   :  { %19 = vsyncpa [#allocation9], 0 }
   0x8   :  { %20 = vsyncpa [#allocation4], 0 }
   0x9   :  { %22 = vsyncpa [#allocation4 + $0x1], 0 }
   0xa   :  { %23 = vsyncpa [#allocation12], 0 }
   0xb   :  { %25 = vsyncpa [#allocation12 + $0x1], 0  ;;  %s1632_s30 = smov 0   ;;  %s1634_s10 = smov 0  }
   0xc   :  { %s1636_s11 = smov 0   ;;  %s1638_s12 = smov 0  }
   0xd   :  { %s1640_s13 = smov 0   ;;  %s1642_s14 = smov 0  }
   0xe LB: > { %2051 = sst [smem:[#allocation19_spill]] %s1548_s30  ;;  %s1663_s15 = sadd.s32 4294967295, %s1568_s14   ;;  %s1568_s14 = sphi %s1642_s14, %s31_s14   ;;  %s1564_s13 = sphi %s1640_s13, %s2081_s13   ;;  %s1560_s12 = sphi %s1638_s12, %s2080_s12   ;;  %s1556_s11 = sphi %s1636_s11, %s2079_s11   ;;  %s1552_s10 = sphi %s1634_s10, %s2078_s10   ;;  %s1548_s30 = sphi %s1632_s30, %s2077_s30  }
   0xf   : > { %s2039_s16 = sadd.s32 4294967294, %s1568_s14   ;;  %p65_p0 = scmp.ne.s32.totalorder %s1552_s10, %s1548_s30 }
  0x10   : > { %p2041_p1 = scmp.eq.s32.totalorder %s1663_s15, 0  ;;  %p223_p3 = scmp.eq.s32.totalorder %s2039_s16, 1 }
  0x11   : > { %p942_p5 = scmp.ge.s32.totalorder %s1568_s14, 1  ;;  %p286_p7 = scmp.lt.s32.totalorder %s1568_s14, 3 }
  0x12   : > { %p1674_p4 = por %p2041_p1, %p65_p0  ;;  %p1679_p6 = por %p223_p3, %p65_p0 }
  0x13   : > { %p1684_p8 = pnand %p942_p5, %p286_p7  ;;  %s1570_s20 = smov [#allocation5]  }
  0x14   : > { %s2052_s17 = scalar_select %p1674_p4, 1, 0 }
  0x15   : > { %s2053_s18 = scalar_select %p1679_p6, 1, 0 }
  0x16   : > { %s2055_s19 = scalar_select %p1684_p8, 1, 0 }
  0x17   : > { %2054 = sst [smem:[#allocation20_spill]] %s2053_s18  ;;  %s298_s21 = sshll.u32 %s1570_s20, 4  ;;  %s1688_s21 = int_to_ptr.vmem [resolvable:$true] %s298_s21 }
  0x18   : > { %p1216_p9 = pneg %p1684_p8  ;;  %s1571_s23 = smov [#allocation7]  }
  0x19   : > { %s314_s24 = sshll.u32 %s1571_s23, 4  ;;  %s1572_s25 = smov [#allocation8]   ;;  %s1699_s24 = int_to_ptr.vmem [resolvable:$true] %s314_s24 }
  0x1a   : > { %p1695_p11 = pnand %p1216_p9, %p2041_p1  ;;  %s1701_s26 = sshll.u32 %s1572_s25, 4  ;;  %s331_s26 = int_to_ptr.vmem [resolvable:$true] %s1701_s26 }
  0x1b   : > { %s1304_s29 = scalar_lea.hbm %s2030_s1, 2048 }
  0x1c   : > { %p1305_p12 = scmp.ne.s32.totalorder %s2030_s1, %s1304_s29  ;;  %p1711_p13 = pneg %p1695_p11 }
  0x1d   : > { %p1311_p5 = scmp.lt.u32.totalorder %s1304_s29, %s2030_s1 }
  0x1e   : > { %p1307_p0 = pnand %p1711_p13, %p1305_p12 }
  0x20   : > { %p1308_p3 = pneg %p1307_p0 }
  0x22   : > { %p1313_p7 = pnand %p1311_p5, %p1308_p3 }
  0x24   : > { %1316 = shalt.err (!%p1313_p7)
}
  0x25   : > { %s1317_s16 = scalar_lea.vmem %s1688_s21, 2048  ;;  %p1325_p2 = scmp.lt.s32.totalorder %s1688_s21, %s1688_s21 }
  0x26   : > { %p1318_p9 = scmp.ne.s32.totalorder %s1688_s21, %s1317_s16  ;;  %p1326_p6 = scmp.lt.s32.totalorder %s1317_s16, %s1317_s16 }
  0x28   : > { %p1320_p10 = pnand %p1318_p9, %p1711_p13  ;;  %p1327_p12 = por %p1326_p6, %p1325_p2 }
  0x2a   : > { %p1321_p1 = pneg %p1320_p10 }
  0x2c   : > { %p1328_p0 = pnand %p1327_p12, %p1321_p1 }
  0x2e   : > { %1331 = shalt.err (!%p1328_p0)
}
  0x2f   : > { %s1573_s27 = smov 128   ;;  %s1574_s28 = smov 8  }
  0x30   : > { %1219 = dma.hbm_to_vmem [thread:$0]  (!%p1695_p11), %s2030_s1, 2048, %s1688_s21, [#allocation6], %s1573_s27, %s1573_s27, %s1574_s28  }
  0x31   : > { %s1332_s16 = scalar_lea.hbm %s2032_s3, 2048 }
  0x32   : > { %p1333_p1 = scmp.ne.s32.totalorder %s2032_s3, %s1332_s16  ;;  %p1339_p10 = scmp.lt.u32.totalorder %s1332_s16, %s2032_s3 }
  0x34   : > { %p1335_p2 = pnand %p1333_p1, %p1711_p13 }
  0x36   : > { %p1336_p6 = pneg %p1335_p2 }
  0x38   : > { %p1341_p3 = pnand %p1339_p10, %p1336_p6 }
  0x3a   : > { %1344 = shalt.err (!%p1341_p3)
}
  0x3b   : > { %s1345_s21 = scalar_lea.vmem %s1699_s24, 2048  ;;  %p1353_p12 = scmp.lt.s32.totalorder %s1699_s24, %s1699_s24 }
  0x3c   : > { %p1346_p5 = scmp.ne.s32.totalorder %s1699_s24, %s1345_s21  ;;  %p1354_p0 = scmp.lt.s32.totalorder %s1345_s21, %s1345_s21 }
  0x3e   : > { %p1348_p7 = pnand %p1346_p5, %p1711_p13  ;;  %p1355_p1 = por %p1354_p0, %p1353_p12 }
  0x40   : > { %p1349_p9 = pneg %p1348_p7 }
  0x42   : > { %p1356_p2 = pnand %p1355_p1, %p1349_p9 }
  0x44   : > { %1359 = shalt.err (!%p1356_p2)
}
  0x45   : > { %1222 = dma.hbm_to_vmem [thread:$0]  (!%p1695_p11), %s2032_s3, 2048, %s1699_s24, [#allocation6], %s1573_s27, %s1573_s27, %s1574_s28  }
  0x46   : > { %s1360_s29 = scalar_lea.hbm %s2034_s5, 2048 }
  0x47   : > { %p1361_p6 = scmp.ne.s32.totalorder %s2034_s5, %s1360_s29  ;;  %p1367_p5 = scmp.lt.u32.totalorder %s1360_s29, %s2034_s5 }
  0x49   : > { %p1363_p10 = pnand %p1361_p6, %p1711_p13 }
  0x4b   : > { %p1364_p3 = pneg %p1363_p10 }
  0x4d   : > { %p1369_p7 = pnand %p1367_p5, %p1364_p3 }
  0x4f   : > { %1372 = shalt.err (!%p1369_p7)
}
  0x50   : > { %s1373_s21 = scalar_lea.vmem %s331_s26, 2048  ;;  %p1381_p1 = scmp.lt.s32.totalorder %s331_s26, %s331_s26 }
  0x51   : > { %p1374_p9 = scmp.ne.s32.totalorder %s331_s26, %s1373_s21  ;;  %p1382_p2 = scmp.lt.s32.totalorder %s1373_s21, %s1373_s21 }
  0x53   : > { %p1376_p12 = pnand %p1374_p9, %p1711_p13  ;;  %p1383_p4 = por %p1382_p2, %p1381_p1 }
  0x55   : > { %p1377_p0 = pneg %p1376_p12 }
  0x57   : > { %p1384_p8 = pnand %p1383_p4, %p1377_p0 }
  0x59   : > { %1387 = shalt.err (!%p1384_p8)
}
  0x5a   : > { %1225 = dma.hbm_to_vmem [thread:$0]  (!%p1695_p11), %s2034_s5, 2048, %s331_s26, [#allocation9], %s1573_s27, %s1573_s27, %s1574_s28  }
  0x5b   : > { %s52_s18 = sadd.s32 1, %s1556_s11  ;;  %s43_s22 = sadd.s32 1, %s1564_s13 }
  0x5c   : > { %p59_p4 = scmp.ne.s32.totalorder %s1556_s11, %s1552_s10  ;;  %p45_p8 = scmp.ge.s32.totalorder %s43_s22, 2 }
  0x5d   : > { %p60_p13 = scmp.eq.s32.totalorder %s1568_s14, 0  ;;  %p2058_p6 = scmp.eq.s32.totalorder %s1663_s15, 1 }
  0x5e   : > { %p1243_p3 = scmp.lt.s32.totalorder %s1568_s14, 2  ;;  %s2083_s22 = smov (%p45_p8, %s43_s22), 0 }
  0x5f   : > { %p1790_p10 = por %p2058_p6, %p59_p4  ;;  %p61_p5 = por %p60_p13, %p59_p4 }
  0x60   : > { %s347_s9 = sand.u32 1, %s1556_s11   ;;  %s47_s30 = ssub.s32 %s1564_s13, %s2083_s22 }
  0x61   : > { %p50_p7 = scmp.eq.s32.totalorder %s47_s30, 0  ;;  %s947_s26 = sshll.u32 %s347_s9, 3 }
  0x62   : > { %s948_s27 = sshll.u32 %s1564_s13, 7  ;;  %s351_s25 = scalar_lea.vmem [#allocation2], %s947_s26 }
  0x63   : > { %s1802_s28 = scalar_select %p50_p7, %s1556_s11, %s52_s18  }
  0x64   : > { %s1807_s23 = scalar_lea.hbm %s2029_s0, %s948_s27  ;;  %s359_s16 = sshll.u32 %s351_s25, 4  ;;  %s1809_s16 = int_to_ptr.vmem [resolvable:$true] %s359_s16 }
  0x65   : > { %p1813_p11 = pnand %p1243_p3, %p61_p5  ;;  %s348_s24 = scalar_lea.sflag [#allocation3], %s347_s9 }
  0x66   : > { %s1388_s6 = scalar_lea.hbm %s1807_s23, 128  ;;  %s1393_s26 = scalar_lea.hbm %s2029_s0, 256 }
  0x67   : > { %p1389_p9 = scmp.ne.s32.totalorder %s1807_s23, %s1388_s6  ;;  %p1390_p12 = pneg %p1813_p11 }
  0x68   : > { %p1394_p2 = scmp.lt.u32.totalorder %s1807_s23, %s2029_s0  ;;  %p1395_p4 = scmp.lt.u32.totalorder %s1393_s26, %s1388_s6 }
  0x69   : > { %p1391_p0 = pnand %p1390_p12, %p1389_p9  ;;  %p1397_p13 = scmp.lt.u32.totalorder %s1388_s6, %s1807_s23 }
  0x6a   : > { %p1396_p8 = por %p1395_p4, %p1394_p2 }
  0x6b   : > { %p1392_p1 = pneg %p1391_p0 }
  0x6c   : > { %p1398_p6 = por %p1397_p13, %p1396_p8 }
  0x6e   : > { %p1399_p3 = pnand %p1398_p6, %p1392_p1 }
  0x70   : > { %1402 = shalt.err (!%p1399_p3)
}
  0x71   : > { %s1403_s9 = scalar_lea.vmem %s1809_s16, 128  ;;  %s1575_s20 = smov [#allocation2]  }
  0x72   : > { %p1404_p5 = scmp.ne.s32.totalorder %s1809_s16, %s1403_s9  ;;  %s1408_s25 = sshll.u32 %s1575_s20, 4  ;;  %s1409_s25 = int_to_ptr.vmem [resolvable:$false] %s1408_s25 }
  0x73   : > { %s1410_s18 = scalar_lea.vmem %s1409_s25, 256  ;;  %p1411_p0 = scmp.lt.s32.totalorder %s1809_s16, %s1409_s25 }
  0x74   : > { %p1406_p7 = pnand %p1404_p5, %p1390_p12  ;;  %p1412_p2 = scmp.lt.s32.totalorder %s1410_s18, %s1403_s9 }
  0x76   : > { %p1407_p9 = pneg %p1406_p7  ;;  %p1413_p4 = por %p1412_p2, %p1411_p0 }
  0x78   : > { %p1414_p8 = pnand %p1413_p4, %p1407_p9 }
  0x7a   : > { %1417 = shalt.err (!%p1414_p8)
}
  0x7b   : > { %1229 = dma.hbm_to_vmem [thread:$0]  (!%p1813_p11), %s1807_s23, 128, %s1809_s16, %s348_s24  }
  0x7c   : > { %p2061_p1 = scmp.ne.s32.totalorder %s2055_s19, 0 }
  0x7d   : > { %s1845_s6 = sand.u32 (!%p2061_p1), 1, %s1552_s10   ;;  %p2062_p12 = scmp.ne.s32.totalorder (!%p2061_p1), %s2052_s17, 0 }
  0x7e   : > { %368 = sbr.rel (%p2061_p1) target bundleno = 498 (0x1f2), region = 48  ;;  %s1848_s30 = sshll.u32 (!%p2061_p1), %s1845_s6, 3 }
  0x7f   : > { %s371_s26 = scalar_lea.sflag (!%p2061_p1), [#allocation3], %s1845_s6  ;;  %s374_s27 = scalar_lea.vmem (!%p2061_p1), [#allocation2], %s1848_s30 }
  0x85   : > { %1527 = dma.done.wait (%p2062_p12), %s371_s26, 128  }
  0x86   : > { %1529 = vsyncadd (%p2062_p12), %s371_s26, 4294967168  ;;  %p2063_p11 = scmp.eq.s32.totalorder %s1663_s15, 0 }
  0x88   : > { %1531 = dma.done.wait (%p2063_p11), [#allocation6], 4096   ;;  %p2064_p13 = pmov %p2063_p11 }
  0x89   : > { %p2065_p6 = pmov %p2063_p11 }
  0x8a   : > { %1533 = vsyncadd (%p2064_p13), [#allocation6], 4294963200 }
  0x8b   : > { %1535 = dma.done.wait (%p2065_p6), [#allocation9], 2048   ;;  %p2066_p3 = pmov %p2065_p6 }
  0x8c   : > { %v1576_v0 = vmov 0.0|0.0   ;;  %vm1577_vm0 = vmmov 0   ;;  %v1578_v1 = vmov 0.0   ;;  %v432_v2 = vld [vmem:[#allocation5] sm:$0xff]  ;;  %v433_v3 = vld [vmem:[#allocation5 + $0x8] sm:$0xff]  ;;  %v434_v5 = vld [vmem:[#allocation5 + $0x10] sm:$0xff] }
  0x8d   : > { %1537 = vsyncadd (%p2066_p3), [#allocation9], 4294965248  ;;  %1124 = vmatprep.subr.bf16.mxu0 %v1576_v0  ;;  %1148 = vmatprep.subr.bf16.mxu1 %v1576_v0  ;;  %v1125_v4 = vpack.c.bf16 %v433_v3, %v432_v2  ;;  %v435_v6 = vld [vmem:[#allocation5 + $0x18] sm:$0xff]  ;;  %v527_v7 = vld [vmem:[#allocation7] sm:$0xff]  ;;  %s1900_s23 = sshll.u32 %s1560_s12, 7  ;;  %s416_s16 = scalar_lea.vmem [#allocation10], %s1848_s30 }
  0x8e   : > { %1051 = vmatprep.mubr.msk.f32.mxu0 %vm1577_vm0, %v1578_v1  ;;  %1086 = vmatprep.mubr.msk.f32.mxu1 %vm1577_vm0, %v1578_v1  ;;  %v528_v8 = vld [vmem:[#allocation7 + $0x8] sm:$0xff]  ;;  %v1128_v10 = vpack.c.bf16 %v435_v6, %v434_v5  ;;  %v529_v11 = vld [vmem:[#allocation7 + $0x10] sm:$0xff]  ;;  %v530_v12 = vld [vmem:[#allocation7 + $0x18] sm:$0xff]  ;;  %s740_s21 = sshll.u32 %s416_s16, 4  ;;  %s2047_s29 = scalar_lea.vmem [#allocation11], %s1848_s30  ;;  %s1916_s21 = int_to_ptr.vmem [resolvable:$true] %s740_s21 }
  0x8f   : > { %1126 = vmatpush3.bf16.xpose.msra.mxu0 %v1125_v4  ;;  %v1149_v9 = vpack.c.bf16 %v528_v8, %v527_v7  ;;  %v436_v13 = vld [vmem:[#allocation5 + $0x20] sm:$0xff]  ;;  %v437_v14 = vld [vmem:[#allocation5 + $0x28] sm:$0xff]  ;;  %v1152_v15 = vpack.c.bf16 %v530_v12, %v529_v11  ;;  %v438_v19 = vld [vmem:[#allocation5 + $0x30] sm:$0xff]  ;;  %s754_s9 = sshll.u32 %s2047_s29, 4  ;;  %s1914_s26 = scalar_lea.hbm %s2036_s7, %s1900_s23  ;;  %s1924_s9 = int_to_ptr.vmem [resolvable:$true] %s754_s9 }
  0x90   : > { %1127 = vmatprep.subr.bf16.mxu0 %v1576_v0  ;;  %v1131_v16 = vpack.c.bf16 %v437_v14, %v436_v13  ;;  %v531_v17 = vld [vmem:[#allocation7 + $0x20] sm:$0xff]  ;;  %v532_v18 = vld [vmem:[#allocation7 + $0x28] sm:$0xff]  ;;  %v439_v20 = vld [vmem:[#allocation5 + $0x38] sm:$0xff]  ;;  %s2067_s19 = sld [smem:[#allocation22_spill]]  ;;  %s716_s20 = scalar_lea.sflag [#allocation4], %s1845_s6 }
  0x91   : > { %1150 = vmatpush3.bf16.xpose.msra.mxu1 %v1149_v9  ;;  %v1155_v21 = vpack.c.bf16 %v532_v18, %v531_v17  ;;  %v1134_v22 = vpack.c.bf16 %v439_v20, %v438_v19  ;;  %v533_v23 = vld [vmem:[#allocation7 + $0x30] sm:$0xff]  ;;  %v534_v24 = vld [vmem:[#allocation7 + $0x38] sm:$0xff]  ;;  %v440_v25 = vld [vmem:[#allocation5 + $0x40] sm:$0xff]  ;;  %s1418_s25 = scalar_lea.vmem %s1916_s21, 128  ;;  %s1579_s18 = smov [#allocation10]  }
  0x92   : > { %1151 = vmatprep.subr.bf16.mxu1 %v1576_v0  ;;  %v441_v26 = vld [vmem:[#allocation5 + $0x48] sm:$0xff]  ;;  %v1158_v27 = vpack.c.bf16 %v534_v24, %v533_v23  ;;  %v535_v29 = vld [vmem:[#allocation7 + $0x40] sm:$0xff]  ;;  %v442_v31 = vld [vmem:[#allocation5 + $0x50] sm:$0xff]  ;;  %p1419_p5 = scmp.ne.s32.totalorder %s1916_s21, %s1418_s25  ;;  %s1422_s12 = sshll.u32 %s1579_s18, 4  ;;  %s1423_s12 = int_to_ptr.vmem [resolvable:$false] %s1422_s12 }
  0x93   : > { %v1137_v28 = vpack.c.bf16 %v441_v26, %v440_v25  ;;  %v536_v30 = vld [vmem:[#allocation7 + $0x48] sm:$0xff]  ;;  %v443_v32 = vld [vmem:[#allocation5 + $0x58] sm:$0xff]  ;;  %v537_v35 = vld [vmem:[#allocation7 + $0x50] sm:$0xff]  ;;  %p1425_p0 = scmp.lt.s32.totalorder %s1916_s21, %s1423_s12 }
  0x94   : > { %v1161_v33 = vpack.c.bf16 %v536_v30, %v535_v29  ;;  %v1140_v34 = vpack.c.bf16 %v443_v32, %v442_v31  ;;  %v538_v36 = vld [vmem:[#allocation7 + $0x58] sm:$0xff]  ;;  %v444_v37 = vld [vmem:[#allocation5 + $0x60] sm:$0xff]  ;;  %v445_v38 = vld [vmem:[#allocation5 + $0x68] sm:$0xff]  ;;  %p1420_p7 = pnand %p1419_p5, %p1790_p10 }
  0x95   : > { %v1164_v39 = vpack.c.bf16 %v538_v36, %v537_v35  ;;  %v1143_v40 = vpack.c.bf16 %v445_v38, %v444_v37  ;;  %v539_v41 = vld [vmem:[#allocation7 + $0x60] sm:$0xff]  ;;  %v540_v42 = vld [vmem:[#allocation7 + $0x68] sm:$0xff]  ;;  %v446_v43 = vld [vmem:[#allocation5 + $0x70] sm:$0xff] }
  0x96   : > { %v447_v44 = vld [vmem:[#allocation5 + $0x78] sm:$0xff]  ;;  %v1167_v45 = vpack.c.bf16 %v540_v42, %v539_v41  ;;  %v541_v47 = vld [vmem:[#allocation7 + $0x70] sm:$0xff]  ;;  %v621_v49 = vld [vmem:[#allocation8] sm:$0xff]  ;;  %s1922_s24 = scalar_lea.hbm %s2067_s19, %s1900_s23  ;;  %p1421_p9 = pneg %p1420_p7 }
  0x97   : > { %1129 = vmatpush3.bf16.xpose.msra.mxu0 %v1128_v10  ;;  %v1146_v46 = vpack.c.bf16 %v447_v44, %v446_v43  ;;  %v542_v48 = vld [vmem:[#allocation7 + $0x78] sm:$0xff]  ;;  %v622_v50 = vld [vmem:[#allocation8 + $0x8] sm:$0xff]  ;;  %v623_v54 = vld [vmem:[#allocation8 + $0x10] sm:$0xff] }
  0x98   : > { %1130 = vmatprep.subr.bf16.mxu0 %v1576_v0  ;;  %v1170_v51 = vpack.c.bf16 %v542_v48, %v541_v47  ;;  %v431_v52 = vld [vmem:[%s374_s27] sm:$0xff]  ;;  %v1173_v53 = vpack.c.bf16 %v622_v50, %v621_v49  ;;  %v625_v57 = vld [vmem:[#allocation8 + $0x20] sm:$0xff]  ;;  %v626_v58 = vld [vmem:[#allocation8 + $0x28] sm:$0xff] }
  0x99   : > { %1153 = vmatpush3.bf16.xpose.msra.mxu1 %v1152_v15  ;;  %v624_v55 = vld [vmem:[#allocation8 + $0x18] sm:$0xff]  ;;  %v1179_v59 = vpack.c.bf16 %v626_v58, %v625_v57  ;;  %v627_v60 = vld [vmem:[#allocation8 + $0x30] sm:$0xff]  ;;  %v629_v63 = vld [vmem:[#allocation8 + $0x40] sm:$0xff] }
  0x9a   : > { %1154 = vmatprep.subr.bf16.mxu1 %v1576_v0  ;;  %v1176_v56 = vpack.c.bf16 %v624_v55, %v623_v54  ;;  %v628_v61 = vld [vmem:[#allocation8 + $0x38] sm:$0xff]  ;;  %v631_v3 = vld [vmem:[#allocation8 + $0x50] sm:$0xff]  ;;  %v633_v6 = vld [vmem:[#allocation8 + $0x60] sm:$0xff] }
  0x9b   : > { %v1182_v62 = vpack.c.bf16 %v628_v61, %v627_v60  ;;  %v632_v4 = vld [vmem:[#allocation8 + $0x58] sm:$0xff]  ;;  %v634_v7 = vld [vmem:[#allocation8 + $0x68] sm:$0xff]  ;;  %v635_v9 = vld [vmem:[#allocation8 + $0x70] sm:$0xff] }
  0x9c   : > { %v1188_v5 = vpack.c.bf16 %v632_v4, %v631_v3  ;;  %v1191_v8 = vpack.c.bf16 %v634_v7, %v633_v6  ;;  %v636_v10 = vld [vmem:[#allocation8 + $0x78] sm:$0xff]  ;;  %v957_v12 = vld [vmem:[%s2031_s2] ss:$0 sm:$0xff] }
  0x9d   : > { %v1194_v11 = vpack.c.bf16 %v636_v10, %v635_v9 }
  0x9f   : > { %1132 = vmatpush3.bf16.xpose.msra.mxu0 %v1131_v16  ;;  %v958_v16 = vld [vmem:[%s2033_s4] ss:$0 sm:$0xff] }
  0xa0   : > { %1133 = vmatprep.subr.bf16.mxu0 %v1576_v0 }
  0xa1   : > { %1156 = vmatpush3.bf16.xpose.msra.mxu1 %v1155_v21 }
  0xa2   : > { %1157 = vmatprep.subr.bf16.mxu1 %v1576_v0 }
  0xa7   : > { %1135 = vmatpush3.bf16.xpose.msra.mxu0 %v1134_v22 }
  0xa8   : > { %1136 = vmatprep.subr.bf16.mxu0 %v1576_v0 }
  0xa9   : > { %1159 = vmatpush3.bf16.xpose.msra.mxu1 %v1158_v27 }
  0xaa   : > { %1160 = vmatprep.subr.bf16.mxu1 %v1576_v0 }
  0xaf   : > { %1138 = vmatpush3.bf16.xpose.msra.mxu0 %v1137_v28 }
  0xb0   : > { %1139 = vmatprep.subr.bf16.mxu0 %v1576_v0 }
  0xb1   : > { %1162 = vmatpush3.bf16.xpose.msra.mxu1 %v1161_v33 }
  0xb2   : > { %1163 = vmatprep.subr.bf16.mxu1 %v1576_v0 }
  0xb7   : > { %1141 = vmatpush3.bf16.xpose.msra.mxu0 %v1140_v34 }
  0xb8   : > { %1142 = vmatprep.subr.bf16.mxu0 %v1576_v0 }
  0xb9   : > { %1165 = vmatpush3.bf16.xpose.msra.mxu1 %v1164_v39 }
  0xba   : > { %1166 = vmatprep.subr.bf16.mxu1 %v1576_v0 }
  0xbf   : > { %1144 = vmatpush3.bf16.xpose.msra.mxu0 %v1143_v40 }
  0xc0   : > { %1145 = vmatprep.subr.bf16.mxu0 %v1576_v0 }
  0xc1   : > { %1168 = vmatpush3.bf16.xpose.msra.mxu1 %v1167_v45 }
  0xc2   : > { %1169 = vmatprep.subr.bf16.mxu1 %v1576_v0 }
  0xc7   : > { %1147 = vmatpush3.bf16.xpose.msra.mxu0 %v1146_v46 }
  0xc8   : > { %1172 = vmatprep.subr.bf16.mxu0 %v1576_v0 }
  0xc9   : > { %1171 = vmatpush3.bf16.xpose.msra.mxu1 %v1170_v51 }
  0xce   : > { %1052 = vmatmul.mubr.f32.vlgmr.msra.gmra.mrb[0].mxu0 %v431_v52 }
  0xcf   : > { %1174 = vmatpush3.bf16.xpose.msra.mxu0 %v1173_v53  ;;  %1121 = vmatprep.mubr.msk.f32.mxu0 %vm1577_vm0, %v1578_v1  ;;  %v630_v1 = vld [vmem:[#allocation8 + $0x48] sm:$0xff] }
  0xd0   : > { %1175 = vmatprep.subr.bf16.mxu0 %v1576_v0  ;;  %1087 = vmatmul.mubr.f32.vlgmr.msra.gmra.mrb[0].mxu1 %v431_v52  ;;  %v1185_v2 = vpack.c.bf16 %v630_v1, %v629_v63 }
  0xd7   : > { %1177 = vmatpush3.bf16.xpose.msra.mxu0 %v1176_v56 }
  0xd8   : > { %1178 = vmatprep.subr.bf16.mxu0 %v1576_v0 }
  0xdf   : > { %1180 = vmatpush3.bf16.xpose.msra.mxu0 %v1179_v59 }
  0xe0   : > { %1181 = vmatprep.subr.bf16.mxu0 %v1576_v0 }
  0xe7   : > { %1183 = vmatpush3.bf16.xpose.msra.mxu0 %v1182_v62 }
  0xe8   : > { %1184 = vmatprep.subr.bf16.mxu0 %v1576_v0 }
  0xef   : > { %1186 = vmatpush3.bf16.xpose.msra.mxu0 %v1185_v2 }
  0xf0   : > { %1187 = vmatprep.subr.bf16.mxu0 %v1576_v0 }
  0xf7   : > { %1189 = vmatpush3.bf16.xpose.msra.mxu0 %v1188_v5 }
  0xf8   : > { %1190 = vmatprep.subr.bf16.mxu0 %v1576_v0 }
  0xff   : > { %1192 = vmatpush3.bf16.xpose.msra.mxu0 %v1191_v8 }
 0x100   : > { %1193 = vmatprep.subr.bf16.mxu0 %v1576_v0 }
 0x107   : > { %1195 = vmatpush3.bf16.xpose.msra.mxu0 %v1194_v11 }
 0x10e   : > { %1122 = vmatmul.mubr.f32.vlgmr.msra.gmra.mrb[2].mxu0 %v431_v52 }
 0x1a1   : > { %v521_v13 = vpop.f32.mrb[0].mxu0 }
 0x1a2   : > { %v522_v14 = vadd.f32 %v957_v12, %v521_v13  ;;  %v1053_v15 = vpop.f32.mrb[1].mxu0 }
 0x1a3   : > { %v616_v17 = vpop.f32.mrb[0].mxu1 }
 0x1a4   : > { %v525_v0 = vmul.f32 0.17677669, %v522_v14  ;;  %v617_v18 = vadd.f32 %v958_v16, %v616_v17  ;;  %v1088_v19 = vpop.f32.mrb[1].mxu1 }
 0x1a6   : > { %526 = vst [vmem:[%s416_s16] sm:$0xff] %v525_v0  ;;  %s1424_s16 = scalar_lea.vmem %s1423_s12, 256 }
 0x1a7   : > { %p1426_p2 = scmp.lt.s32.totalorder %s1424_s16, %s1418_s25 }
 0x1a9   : > { %p1427_p4 = por %p1426_p2, %p1425_p0 }
 0x1ab   : > { %p1428_p8 = pnand %p1427_p4, %p1421_p9 }
 0x1ad   : > { %1431 = shalt.err (!%p1428_p8)
}
 0x1ae   : > { %s1432_s6 = scalar_lea.hbm %s1914_s26, 128  ;;  %s1436_s18 = scalar_lea.hbm %s2036_s7, 256 }
 0x1af   : > { %p1433_p1 = scmp.ne.s32.totalorder %s1914_s26, %s1432_s6  ;;  %p1437_p13 = scmp.lt.u32.totalorder %s1914_s26, %s2036_s7 }
 0x1b0   : > { %p1438_p6 = scmp.lt.u32.totalorder %s1436_s18, %s1432_s6  ;;  %p1440_p5 = scmp.lt.u32.totalorder %s1432_s6, %s1914_s26 }
 0x1b1   : > { %p1434_p12 = pnand %p1433_p1, %p1790_p10 }
 0x1b2   : > { %p1439_p3 = por %p1438_p6, %p1437_p13 }
 0x1b3   : > { %p1435_p11 = pneg %p1434_p12 }
 0x1b4   : > { %p1441_p7 = por %p1440_p5, %p1439_p3 }
 0x1b6   : > { %p1442_p9 = pnand %p1441_p7, %p1435_p11 }
 0x1b8   : > { %1445 = shalt.err (!%p1442_p9)
}
 0x1b9   : > { %1210 = dma.vmem_to_hbm [thread:$0]  (%p1790_p10), %s1916_s21, 128, %s1914_s26, %s716_s20  }
 0x1ba   : > { %s2068_s25 = scalar_lea.vmem [#allocation11], %s1848_s30  ;;  %s2069_s29 = sand.u32 1, %s1663_s15  }
 0x1bb   : > { %620 = vst [vmem:[%s2068_s25] sm:$0xff] %v617_v18  ;;  %s1952_s16 = scalar_lea.sflag [#allocation12], %s2069_s29  ;;  %s1446_s6 = scalar_lea.vmem %s1924_s9, 128 }
 0x1bc   : > { %p1447_p0 = scmp.ne.s32.totalorder %s1924_s9, %s1446_s6  ;;  %s1580_s27 = smov [#allocation11]  }
 0x1bd   : > { %s1450_s17 = sshll.u32 %s1580_s27, 4  ;;  %s1451_s17 = int_to_ptr.vmem [resolvable:$false] %s1450_s17 }
 0x1be   : > { %p1448_p2 = pnand %p1447_p0, %p1790_p10  ;;  %s1452_s18 = scalar_lea.vmem %s1451_s17, 256 }
 0x1bf   : > { %p1453_p8 = scmp.lt.s32.totalorder %s1924_s9, %s1451_s17  ;;  %p1454_p1 = scmp.lt.s32.totalorder %s1452_s18, %s1446_s6 }
 0x1c0   : > { %p1449_p4 = pneg %p1448_p2 }
 0x1c1   : > { %p1455_p12 = por %p1454_p1, %p1453_p8 }
 0x1c3   : > { %p1456_p11 = pnand %p1455_p12, %p1449_p4 }
 0x1c5   : > { %1459 = shalt.err (!%p1456_p11)
}
 0x1c6   : > { %s1460_s15 = scalar_lea.hbm %s1922_s24, 128  ;;  %s1464_s20 = scalar_lea.hbm %s2067_s19, 256 }
 0x1c7   : > { %p1461_p13 = scmp.ne.s32.totalorder %s1922_s24, %s1460_s15  ;;  %p1465_p5 = scmp.lt.u32.totalorder %s1922_s24, %s2067_s19 }
 0x1c8   : > { %p1466_p7 = scmp.lt.u32.totalorder %s1464_s20, %s1460_s15  ;;  %p1468_p0 = scmp.lt.u32.totalorder %s1460_s15, %s1922_s24 }
 0x1c9   : > { %p1462_p6 = pnand %p1461_p13, %p1790_p10 }
 0x1ca   : > { %p1467_p9 = por %p1466_p7, %p1465_p5 }
 0x1cb   : > { %p1463_p3 = pneg %p1462_p6 }
 0x1cc   : > { %p1469_p2 = por %p1468_p0, %p1467_p9 }
 0x1ce   : > { %p1470_p4 = pnand %p1469_p2, %p1463_p3 }
 0x1d0   : > { %1473 = shalt.err (!%p1470_p4)
}
 0x1d1   : > { %1211 = dma.vmem_to_hbm [thread:$0]  (%p1790_p10), %s1924_s9, 128, %s1922_s24, %s1952_s16  }
 0x1d2   : > { %s2070_s27 = sld [smem:[#allocation21_spill]]  ;;  %s430_s17 = scalar_lea.vmem [#allocation13], %s1848_s30 }
 0x1d3   : > { %s768_s18 = sshll.u32 %s430_s17, 4  ;;  %s2071_s26 = sld [smem:[#allocation23_spill]]  ;;  %s769_s18 = int_to_ptr.vmem [resolvable:$true] %s768_s18 }
 0x1d4   : > { %s1474_s12 = scalar_lea.vmem %s769_s18, 128  ;;  %s1581_s24 = smov [#allocation13]  }
 0x1d5   : > { %p1475_p8 = scmp.ne.s32.totalorder %s769_s18, %s1474_s12  ;;  %s1478_s9 = sshll.u32 %s1581_s24, 4  ;;  %s1479_s9 = int_to_ptr.vmem [resolvable:$false] %s1478_s9 }
 0x1d6   : > { %s1480_s30 = scalar_lea.vmem %s1479_s9, 256  ;;  %p1481_p11 = scmp.lt.s32.totalorder %s769_s18, %s1479_s9 }
 0x1d7   : > { %p1476_p1 = pnand %p1475_p8, %p1790_p10  ;;  %p1482_p13 = scmp.lt.s32.totalorder %s1480_s30, %s1474_s12 }
 0x1d8   : > { %v959_v20 = vld [vmem:[%s2070_s27] ss:$0 sm:$0xff] }
 0x1d9   : > { %s1984_s20 = scalar_lea.hbm %s2071_s26, %s1900_s23  ;;  %p1477_p12 = pneg %p1476_p1 }
 0x1da   : > { %p1483_p6 = por %p1482_p13, %p1481_p11 }
 0x1dc   : > { %p1484_p3 = pnand %p1483_p6, %p1477_p12 }
 0x1e1   : > { %v710_v21 = vpop.f32.mrb[2].mxu0 }
 0x1e2   : > { %v711_v22 = vadd.f32 %v959_v20, %v710_v21  ;;  %v1123_v23 = vpop.f32.mrb[3].mxu0 }
 0x1e4   : > { %714 = vst [vmem:[%s430_s17] sm:$0xff] %v711_v22 }
 0x1e5   : > { %1487 = shalt.err (!%p1484_p3)
}
 0x1e6   : > { %s1488_s23 = scalar_lea.hbm %s1984_s20, 128  ;;  %s1492_s6 = scalar_lea.hbm %s2071_s26, 256 }
 0x1e7   : > { %p1489_p5 = scmp.ne.s32.totalorder %s1984_s20, %s1488_s23  ;;  %p1493_p0 = scmp.lt.u32.totalorder %s1984_s20, %s2071_s26 }
 0x1e8   : > { %p1494_p2 = scmp.lt.u32.totalorder %s1492_s6, %s1488_s23  ;;  %p1496_p8 = scmp.lt.u32.totalorder %s1488_s23, %s1984_s20 }
 0x1e9   : > { %p1490_p7 = pnand %p1489_p5, %p1790_p10 }
 0x1ea   : > { %p1495_p4 = por %p1494_p2, %p1493_p0 }
 0x1eb   : > { %p1491_p9 = pneg %p1490_p7 }
 0x1ec   : > { %p1497_p1 = por %p1496_p8, %p1495_p4 }
 0x1ee   : > { %p1498_p12 = pnand %p1497_p1, %p1491_p9 }
 0x1f0   : > { %1501 = shalt.err (!%p1498_p12)
}
 0x1f1   : > { %1212 = dma.vmem_to_hbm [thread:$0]  (%p1790_p10), %s769_s18, 128, %s1984_s20, %s1952_s16  }
 0x1f2 PF: > { %s2072_s15 = sld [smem:[#allocation19_spill]]  ;;  %s2073_s21 = sld [smem:[#allocation20_spill]] }
 0x1f3   : > { %p2075_p13 = scmp.ge.s32.totalorder %s1568_s14, 2 }
 0x1f8   : > { %s780_s12 = sand.u32 1, %s2072_s15   ;;  %p2074_p11 = scmp.ne.s32.totalorder %s2073_s21, 0 }
 0x1f9   : > { %s781_s24 = scalar_lea.sflag [#allocation4], %s780_s12 }
 0x1fa   : > { %p1231_p6 = pnand %p2075_p13, %p2074_p11 }
 0x1fc   : > { %1539 = dma.done.wait (!%p1231_p6), %s781_s24, 128  }
 0x1fd   : > { %1541 = vsyncadd (!%p1231_p6), %s781_s24, 4294967168  ;;  %s2076_s9 = sadd.s32 4294967294, %s1568_s14  }
 0x1fe   : > { %s789_s30 = sand.u32 1, %s2076_s9  }
 0x1ff   : > { %s790_s23 = scalar_lea.sflag [#allocation12], %s789_s30 }
 0x200   : > { %1543 = dma.done.wait (!%p1231_p6), %s790_s23, 256  }
 0x201   : > { %1545 = vsyncadd (!%p1231_p6), %s790_s23, 4294967040  ;;  %s31_s14 = sadd.s32 1, %s1568_s14   ;;  %s2077_s30 = smov %s1552_s10 }
 0x202   : > { %p28_p10 = scmp.ge.s32.totalorder %s31_s14, 4   ;;  %s2078_s10 = smov %s1556_s11 }
 0x203   : > { %s2079_s11 = smov %s1802_s28  ;;  %s2080_s12 = smov %s1564_s13 }
 0x204   : > { %s2081_s13 = smov %s2083_s22  ;;  %30 = sbr.rel (!%p28_p10) target bundleno = 14 (0xe), region = 137 }
 0x20b   :  { %804 = vsyncpa [#allocation3], 1 }
 0x20c   :  { %806 = vsyncpa [#allocation3 + $0x1], 1 }
 0x20d   :  { %807 = vsyncpa [#allocation6], 1 }
 0x20e   :  { %808 = vsyncpa [#allocation9], 1 }
 0x20f   :  { %809 = vsyncpa [#allocation4], 1 }
 0x210   :  { %811 = vsyncpa [#allocation4 + $0x1], 1 }
 0x211   :  { %812 = vsyncpa [#allocation12], 1 }
 0x212   :  { %814 = vsyncpa [#allocation12 + $0x1], 1 }

</bundles_post_ra>
